<compile_context>
chip_gen: v6e
topology: v6e:2x2x1
jax: 0.10.0
libtpu: 0.0.40
codegen_flags: <defaults>
</compile_context>

<pallas_src>
import functools

import jax
import jax.numpy as jnp
from jax.experimental import pallas as pl
from jax.experimental.pallas import tpu as pltpu


def _patch_merge_ln_kernel(x_ref, g_ref, b_ref, o_ref, *, eps):
    # x_ref: (tr, 2, Wp, 2C)  -- dim1 = row parity (r), lanes = (s, c), s in {0,1}
    # g_ref/b_ref: (1, 1, 4C)
    # o_ref: (tr, Wp, 4C)
    even = x_ref[:, 0, :, :]     # rows 2i   : (tr, Wp, 2C), native dtype
    odd = x_ref[:, 1, :, :]      # rows 2i+1 : (tr, Wp, 2C), native dtype
    c = even.shape[-1] // 2

    # Channel order must match torch.cat([x0, x1, x2, x3], -1):
    #   x0 = (even row, even col) | x1 = (odd row, even col)
    #   x2 = (even row, odd col)  | x3 = (odd row, odd col)
    # Concat in the input dtype; upcast once afterwards for the statistics.
    merged = jnp.concatenate(
        [even[..., :c], odd[..., :c], even[..., c:], odd[..., c:]], axis=-1
    )  # (tr, Wp, 4C), native dtype
    m32 = merged.astype(jnp.float32)

    c4 = m32.shape[-1]
    inv_n = jnp.float32(1.0 / c4)
    # Two independent reductions (overlap on the XLU), f32 accumulation.
    s1 = jnp.sum(m32, axis=-1, keepdims=True)
    s2 = jnp.sum(m32 * m32, axis=-1, keepdims=True)
    mean = s1 * inv_n
    var = jnp.maximum(s2 * inv_n - mean * mean, 0.0)
    inv = jax.lax.rsqrt(var + eps)

    y = (m32 - mean) * inv
    y = y * g_ref[...].astype(jnp.float32) + b_ref[...].astype(jnp.float32)
    o_ref[...] = y.astype(o_ref.dtype)


def _choose_row_tile(num_groups, group_io_bytes, group_f32_bytes,
                     vmem_budget_bytes, min_steps=8):
    """Pick the per-block row-group tile.

    VMEM per row-group per step ~= 2x input + 2x output double buffers
    (same size) + f32 intermediates.  Also keep >= min_steps grid steps
    (when possible) so the software pipeline can hide the first fetch and
    last writeback and both v7x TensorCores receive several blocks.
    Non-divisor tiles are fine: the grid uses cdiv and the last partial
    block is masked by Pallas.
    """
    per_group = 4 * group_io_bytes + group_f32_bytes
    max_rows = max(1, int(vmem_budget_bytes) // max(1, int(per_group)))
    steps_cap = max(1, pl.cdiv(num_groups, min_steps))
    return max(1, min(max_rows, steps_cap, num_groups))


def patch_merging_forward(x, gamma, beta, H, W, *, eps=1e-5,
                          vmem_budget_bytes=24 << 20):
    """PatchMerging forward.

    x:     (B, H*W, C)
    gamma: (4*C,)   LayerNorm weight
    beta:  (4*C,)   LayerNorm bias
    returns (B, (H//2)*(W//2), 4*C)
    """
    B, L, C = x.shape
    assert L == H * W, "input feature has wrong size"
    assert H % 2 == 0 and W % 2 == 0, f"x size ({H}*{W}) are not even."
    Hp, Wp = H // 2, W // 2
    C4 = 4 * C
    G = B * Hp  # merged-row groups; each yields Wp output tokens

    # Free (contiguous) reshape: (B, H*W, C) -> (G, 2, Wp, 2C).
    #   index (b*Hp+i, r, j, s*C+c)  <->  x[b, (2i+r)*W + (2j+s), c]
    x4 = x.reshape(G, 2, Wp, 2 * C)
    g3 = gamma.reshape(1, 1, C4)
    b3 = beta.reshape(1, 1, C4)

    itemsize = jnp.dtype(x.dtype).itemsize
    group_io_bytes = Wp * C4 * itemsize        # per row-group: input == output bytes
    group_f32_bytes = 2 * Wp * C4 * 4          # f32 intermediates (merged + y)
    tr = _choose_row_tile(G, group_io_bytes, group_f32_bytes, vmem_budget_bytes)
    n_steps = pl.cdiv(G, tr)

    n_tokens = G * Wp
    cost = pl.CostEstimate(
        flops=8 * n_tokens * C4,                  # sums / normalize / affine
        transcendentals=n_tokens,                 # one rsqrt per token
        bytes_accessed=2 * n_tokens * C4 * itemsize + 2 * C4 * 4,
    )

    out = pl.pallas_call(
        functools.partial(_patch_merge_ln_kernel, eps=eps),
        out_shape=jax.ShapeDtypeStruct((G, Wp, C4), x.dtype),
        grid_spec=pltpu.PrefetchScalarGridSpec(
            num_scalar_prefetch=0,
            grid=(n_steps,),
            in_specs=[
                pl.BlockSpec((tr, 2, Wp, 2 * C), lambda g: (g, 0, 0, 0)),
                pl.BlockSpec((1, 1, C4), lambda g: (0, 0, 0)),
                pl.BlockSpec((1, 1, C4), lambda g: (0, 0, 0)),
            ],
            out_specs=pl.BlockSpec((tr, Wp, C4), lambda g: (g, 0, 0)),
        ),
        compiler_params=pltpu.CompilerParams(
            dimension_semantics=("parallel",),
            vmem_limit_bytes=32 << 20,            # safe on v5e/v6e/v7x
        ),
        cost_estimate=cost,
    )(x4, g3, b3)

    return out.reshape(B, Hp * Wp, C4)


if __name__ == "__main__":
    # Small shapes: batch=2, H=W=16 (so L=256), dim=C=32 -> output (2, 64, 128).
    B, H, W, C = 2, 16, 16, 32
    EPS = 1e-5

    key = jax.random.PRNGKey(0)
    k_x, k_g, k_b = jax.random.split(key, 3)

    x = jax.random.normal(k_x, (B, H * W, C), dtype=jnp.float32)
    gamma = 1.0 + 0.1 * jax.random.normal(k_g, (4 * C,), dtype=jnp.float32)
    beta = 0.1 * jax.random.normal(k_b, (4 * C,), dtype=jnp.float32)

    out = patch_merging_forward(x, gamma, beta, H, W, eps=EPS)
    out = jax.block_until_ready(out)

    # Pure-JAX reference mirroring the PyTorch module.
    xr = x.reshape(B, H, W, C)
    x0 = xr[:, 0::2, 0::2, :]
    x1 = xr[:, 1::2, 0::2, :]
    x2 = xr[:, 0::2, 1::2, :]
    x3 = xr[:, 1::2, 1::2, :]
    cat = jnp.concatenate([x0, x1, x2, x3], axis=-1).reshape(B, -1, 4 * C)
    mean = jnp.mean(cat, axis=-1, keepdims=True)
    var = jnp.mean((cat - mean) ** 2, axis=-1, keepdims=True)
    ref = (cat - mean) / jnp.sqrt(var + EPS) * gamma + beta

    assert out.shape == (B, (H // 2) * (W // 2), 4 * C), out.shape
    assert jnp.allclose(out, ref, atol=2e-5, rtol=1e-5), "mismatch vs reference"

    print("KERNEL_OK")
</pallas_src>

<mosaic_0001>
module attributes {stable_mosaic.version = 11 : i64} {
  func.func @_patch_merge_ln_kernel(%arg0: i32, %arg1: memref<2x2x8x64xf32, #tpu.memory_space<vmem>>, %arg2: memref<1x1x128xf32, #tpu.memory_space<vmem>>, %arg3: memref<1x1x128xf32, #tpu.memory_space<vmem>>, %arg4: memref<2x8x128xf32, #tpu.memory_space<vmem>>) attributes {dimension_semantics = [#tpu.dimension_semantics<parallel>], iteration_bounds = array<i64: 8>, scalar_prefetch = 0 : i64, scratch_operands = 0 : i64, tpu.core_type = #tpu.core_type<tc>, window_params = [{transform_indices = @transform_0, window_bounds = array<i64: 2, 2, 8, 64>}, {pipeline_mode = #tpu.pipeline_mode<synchronous>, transform_indices = @transform_1, window_bounds = array<i64: 1, 1, 128>}, {pipeline_mode = #tpu.pipeline_mode<synchronous>, transform_indices = @transform_2, window_bounds = array<i64: 1, 1, 128>}, {transform_indices = @transform_3, window_bounds = array<i64: 2, 8, 128>}]} {
    %c0 = arith.constant 0 : index
    %c0_0 = arith.constant 0 : index
    %c0_1 = arith.constant 0 : index
    %c0_2 = arith.constant 0 : index
    %0 = vector.load %arg1[%c0, %c0_0, %c0_1, %c0_2] : memref<2x2x8x64xf32, #tpu.memory_space<vmem>>, vector<2x1x8x64xf32>
    %1 = vector.shape_cast %0 : vector<2x1x8x64xf32> to vector<2x8x64xf32>
    %c0_3 = arith.constant 0 : index
    %c1 = arith.constant 1 : index
    %c0_4 = arith.constant 0 : index
    %c0_5 = arith.constant 0 : index
    %2 = vector.load %arg1[%c0_3, %c1, %c0_4, %c0_5] : memref<2x2x8x64xf32, #tpu.memory_space<vmem>>, vector<2x1x8x64xf32>
    %3 = vector.shape_cast %2 : vector<2x1x8x64xf32> to vector<2x8x64xf32>
    %4 = vector.extract_strided_slice %1 {offsets = [0, 0, 0], sizes = [2, 8, 32], strides = [1, 1, 1]} : vector<2x8x64xf32> to vector<2x8x32xf32>
    %5 = vector.extract_strided_slice %3 {offsets = [0, 0, 0], sizes = [2, 8, 32], strides = [1, 1, 1]} : vector<2x8x64xf32> to vector<2x8x32xf32>
    %6 = vector.extract_strided_slice %1 {offsets = [0, 0, 32], sizes = [2, 8, 32], strides = [1, 1, 1]} : vector<2x8x64xf32> to vector<2x8x32xf32>
    %7 = vector.extract_strided_slice %3 {offsets = [0, 0, 32], sizes = [2, 8, 32], strides = [1, 1, 1]} : vector<2x8x64xf32> to vector<2x8x32xf32>
    %8 = tpu.concatenate %4, %5, %6, %7 in 2 : vector<2x8x32xf32>, vector<2x8x32xf32>, vector<2x8x32xf32>, vector<2x8x32xf32> -> vector<2x8x128xf32>
    %cst = arith.constant dense<0.000000e+00> : vector<2x8xf32>
    %9 = vector.multi_reduction <add>, %8, %cst [2] : vector<2x8x128xf32> to vector<2x8xf32>
    %10 = vector.shape_cast %9 : vector<2x8xf32> to vector<2x8x1xf32>
    %11 = arith.mulf %8, %8 : vector<2x8x128xf32>
    %cst_6 = arith.constant dense<0.000000e+00> : vector<2x8xf32>
    %12 = vector.multi_reduction <add>, %11, %cst_6 [2] : vector<2x8x128xf32> to vector<2x8xf32>
    %13 = vector.shape_cast %12 : vector<2x8xf32> to vector<2x8x1xf32>
    %cst_7 = arith.constant 7.812500e-03 : f32
    %14 = vector.broadcast %cst_7 : f32 to vector<2x8x1xf32>
    %15 = arith.mulf %10, %14 : vector<2x8x1xf32>
    %cst_8 = arith.constant 7.812500e-03 : f32
    %16 = vector.broadcast %cst_8 : f32 to vector<2x8x1xf32>
    %17 = arith.mulf %13, %16 : vector<2x8x1xf32>
    %18 = arith.mulf %15, %15 : vector<2x8x1xf32>
    %19 = arith.subf %17, %18 : vector<2x8x1xf32>
    %cst_9 = arith.constant 0.000000e+00 : f32
    %20 = vector.broadcast %cst_9 : f32 to vector<2x8x1xf32>
    %21 = arith.maximumf %19, %20 : vector<2x8x1xf32>
    %cst_10 = arith.constant 9.99999974E-6 : f32
    %22 = vector.broadcast %cst_10 : f32 to vector<2x8x1xf32>
    %23 = arith.addf %21, %22 : vector<2x8x1xf32>
    %24 = math.rsqrt %23 : vector<2x8x1xf32>
    %25 = vector.broadcast %15 : vector<2x8x1xf32> to vector<2x8x128xf32>
    %26 = arith.subf %8, %25 : vector<2x8x128xf32>
    %27 = vector.broadcast %24 : vector<2x8x1xf32> to vector<2x8x128xf32>
    %28 = arith.mulf %26, %27 : vector<2x8x128xf32>
    %c0_11 = arith.constant 0 : index
    %c0_12 = arith.constant 0 : index
    %c0_13 = arith.constant 0 : index
    %29 = vector.load %arg2[%c0_11, %c0_12, %c0_13] : memref<1x1x128xf32, #tpu.memory_space<vmem>>, vector<1x1x128xf32>
    %30 = vector.broadcast %29 : vector<1x1x128xf32> to vector<2x8x128xf32>
    %31 = arith.mulf %28, %30 : vector<2x8x128xf32>
    %c0_14 = arith.constant 0 : index
    %c0_15 = arith.constant 0 : index
    %c0_16 = arith.constant 0 : index
    %32 = vector.load %arg3[%c0_14, %c0_15, %c0_16] : memref<1x1x128xf32, #tpu.memory_space<vmem>>, vector<1x1x128xf32>
    %33 = vector.broadcast %32 : vector<1x1x128xf32> to vector<2x8x128xf32>
    %34 = arith.addf %31, %33 : vector<2x8x128xf32>
    %c0_17 = arith.constant 0 : index
    %c0_18 = arith.constant 0 : index
    %c0_19 = arith.constant 0 : index
    %35 = vector.load %arg4[%c0_17, %c0_18, %c0_19] : memref<2x8x128xf32, #tpu.memory_space<vmem>>, vector<2x8x128xf32>
    tpu.vector_store %arg4[%c0_17, %c0_18, %c0_19], %34 {strides = array<i32>} : memref<2x8x128xf32, #tpu.memory_space<vmem>>, vector<2x8x128xf32>,
    return
  }
  func.func @transform_0(%arg0: i32) -> (i32, i32, i32, i32) {
    %c0_i32 = arith.constant 0 : i32
    %c0_i32_0 = arith.constant 0 : i32
    %c0_i32_1 = arith.constant 0 : i32
    %c0_i32_2 = arith.constant 0 : i32
    return %arg0, %c0_i32, %c0_i32_0, %c0_i32_1 : i32, i32, i32, i32
  }
  func.func @transform_1(%arg0: i32) -> (i32, i32, i32) {
    %c0_i32 = arith.constant 0 : i32
    %c0_i32_0 = arith.constant 0 : i32
    %c0_i32_1 = arith.constant 0 : i32
    %c0_i32_2 = arith.constant 0 : i32
    return %c0_i32, %c0_i32_0, %c0_i32_1 : i32, i32, i32
  }
  func.func @transform_2(%arg0: i32) -> (i32, i32, i32) {
    %c0_i32 = arith.constant 0 : i32
    %c0_i32_0 = arith.constant 0 : i32
    %c0_i32_1 = arith.constant 0 : i32
    %c0_i32_2 = arith.constant 0 : i32
    return %c0_i32, %c0_i32_0, %c0_i32_1 : i32, i32, i32
  }
  func.func @transform_3(%arg0: i32) -> (i32, i32, i32) {
    %c0_i32 = arith.constant 0 : i32
    %c0_i32_0 = arith.constant 0 : i32
    %c0_i32_1 = arith.constant 0 : i32
    return %arg0, %c0_i32, %c0_i32_0 : i32, i32, i32
  }
}

</mosaic_0001>

<bundles_post_ra>
// kernel: tpu_custom_call.1
= control target key start
LH: loop header
LB: loop body
LE: loop exit
PB: predicated region body
PF: predicated region fallthrough
CT: control target
= control target key end

     0   :  { %8 = vsyncpa [#allocation3], 0  ;;  %s722_s0 = inlined_call_operand.hbm [shape: f32[16,2,8,64], index: 0, kind: input, shape index: {}]   ;;  %s723_s1 = inlined_call_operand.vmem [shape: f32[1,1,128], index: 1, kind: input, shape index: {}]   ;;  %s724_s2 = inlined_call_operand.vmem [shape: f32[1,1,128], index: 2, kind: input, shape index: {}]   ;;  %s725_s3 = inlined_call_operand.hbm [shape: f32[16,8,128], index: 3, kind: output, shape index: {}]  }
   0x1   :  { %10 = vsyncpa [#allocation3 + $0x1], 0 }
   0x2   :  { %11 = vsyncpa [#allocation4], 0 }
   0x3   :  { %13 = vsyncpa [#allocation4 + $0x1], 0  ;;  %s563_s12 = smov 0   ;;  %s565_s13 = smov 0  }
   0x4   :  { %s567_s14 = smov 0   ;;  %s569_s15 = smov 0  }
   0x5 LB: > { %s584_s16 = sadd.s32 4294967295, %s533_s15   ;;  %s363_s17 = sadd.s32 4294967294, %s533_s15   ;;  %s533_s15 = sphi %s569_s15, %s739_s15   ;;  %s529_s14 = sphi %s567_s14, %s738_s14   ;;  %s525_s13 = sphi %s565_s13, %s737_s13   ;;  %s521_s12 = sphi %s563_s12, %s736_s12  }
   0x6   : > { %s588_s18 = sadd.s32 1, %s533_s15   ;;  %s26_s19 = sadd.s32 1, %s529_s14 }
   0x7   : > { %s23_s20 = ssub.s32 %s533_s15, %s588_s18  ;;  %p33_p0 = scmp.ne.s32.totalorder %s529_s14, %s525_s13 }
   0x8   : > { %p24_p1 = scmp.eq.s32.totalorder %s23_s20, 0  ;;  %p34_p2 = scmp.eq.s32.totalorder %s533_s15, 0 }
   0x9   : > { %p39_p3 = scmp.ne.s32.totalorder %s525_s13, %s521_s12  ;;  %p40_p4 = scmp.eq.s32.totalorder %s584_s16, 0 }
   0xa   : > { %s600_s21 = scalar_select %p24_p1, %s529_s14, %s26_s19  }
   0xb   : > { %p602_p5 = por %p34_p2, %p33_p0  ;;  %p606_p6 = por %p40_p4, %p39_p3 }
   0xc   : > { %p105_p7 = scmp.eq.s32.totalorder %s584_s16, 7  ;;  %p111_p8 = scmp.eq.s32.totalorder %s363_s17, 7 }
   0xd   : > { %s729_s23 = scalar_select %p606_p6, 1, 0 }
   0xe   : > { %p397_p9 = scmp.lt.s32.totalorder %s533_s15, 8  ;;  %p612_p10 = por %p105_p7, %p33_p0 }
   0xf   : > { %p616_p11 = por %p111_p8, %p39_p3  ;;  %s137_s26 = sand.u32 1, %s529_s14  }
  0x10   : > { %s730_s24 = scalar_select %p612_p10, 1, 0 }
  0x11   : > { %s731_s25 = scalar_select %p616_p11, 1, 0 }
  0x12   : > { %s383_s27 = sshll.u32 %s533_s15, 9  ;;  %s366_s28 = sshll.u32 %s137_s26, 5 }
  0x13   : > { %s625_s4 = scalar_lea.hbm %s722_s0, %s383_s27  ;;  %s141_s5 = scalar_lea.vmem [#allocation2], %s366_s28 }
  0x14   : > { %s149_s6 = sshll.u32 %s141_s5, 4  ;;  %p629_p12 = pnand %p397_p9, %p602_p5  ;;  %s633_s6 = int_to_ptr.vmem [resolvable:$true] %s149_s6 }
  0x15   : > { %s635_s8 = scalar_lea.sflag [#allocation3], %s137_s26  ;;  %s441_s9 = scalar_lea.hbm %s625_s4, 512 }
  0x16   : > { %p442_p13 = scmp.ne.s32.totalorder %s625_s4, %s441_s9  ;;  %p443_p0 = pneg %p629_p12 }
  0x17   : > { %s446_s17 = scalar_lea.hbm %s722_s0, 4096  ;;  %p447_p3 = scmp.lt.s32.totalorder %s625_s4, %s722_s0 }
  0x18   : > { %p444_p1 = pnand %p443_p0, %p442_p13  ;;  %p448_p4 = scmp.lt.s32.totalorder %s446_s17, %s441_s9 }
  0x1a   : > { %p445_p2 = pneg %p444_p1  ;;  %p449_p5 = por %p448_p4, %p447_p3 }
  0x1c   : > { %p450_p7 = pnand %p449_p5, %p445_p2 }
  0x1e   : > { %453 = shalt.err (!%p450_p7)
}
  0x1f   : > { %s454_s22 = scalar_lea.vmem %s633_s6, 512  ;;  %s535_s26 = smov [#allocation2]  }
  0x20   : > { %p455_p8 = scmp.ne.s32.totalorder %s633_s6, %s454_s22  ;;  %s459_s27 = sshll.u32 %s535_s26, 4  ;;  %s460_s27 = int_to_ptr.vmem [resolvable:$false] %s459_s27 }
  0x21   : > { %s461_s28 = scalar_lea.vmem %s460_s27, 1024  ;;  %p462_p1 = scmp.lt.s32.totalorder %s633_s6, %s460_s27 }
  0x22   : > { %p457_p9 = pnand %p455_p8, %p443_p0  ;;  %p463_p11 = scmp.lt.s32.totalorder %s461_s28, %s454_s22 }
  0x24   : > { %p458_p13 = pneg %p457_p9  ;;  %p464_p10 = por %p463_p11, %p462_p1 }
  0x26   : > { %p465_p6 = pnand %p464_p10, %p458_p13 }
  0x28   : > { %468 = shalt.err (!%p465_p6)
}
  0x29   : > { %s536_s29 = smov 128   ;;  %s537_s30 = smov 8  }
  0x2a   : > { %392 = dma.hbm_to_vmem [thread:$0]  (!%p629_p12), %s625_s4, 512, %s633_s6, %s635_s8, %s536_s29, %s536_s29, %s537_s30  }
  0x2b   : > { %p370_p0 = scmp.ge.s32.totalorder %s533_s15, 1  ;;  %p157_p2 = scmp.lt.s32.totalorder %s533_s15, 9 }
  0x2d   : > { %p158_p3 = pnand %p370_p0, %p157_p2 }
  0x2e   : > { %s659_s5 = sand.u32 (!%p158_p3), 1, %s525_s13   ;;  %p733_p6 = scmp.ne.s32.totalorder (!%p158_p3), %s729_s23, 0 }
  0x2f   : > { %161 = sbr.rel (%p158_p3) target bundleno = 366 (0x16e), region = 32  ;;  %s371_s9 = sshll.u32 (!%p158_p3), %s659_s5, 5 }
  0x30   : > { %s164_s10 = scalar_lea.sflag (!%p158_p3), [#allocation3], %s659_s5  ;;  %s167_s11 = scalar_lea.vmem (!%p158_p3), [#allocation2], %s371_s9 }
  0x34   : > { %512 = dma.done.wait (%p733_p6), %s164_s10, 512  }
  0x35   : > { %514 = vsyncadd (%p733_p6), %s164_s10, 4294966784  ;;  %v373_v0 = vld [vmem:[%s167_s11 + $0x8] sm:$0xff]  ;;  %v192_v1 = vld [vmem:[%s167_s11] sm:$0xff]  ;;  %s538_s4 = smov 32   ;;  %s539_s6 = smov 64   ;;  %vm219_vm0 = vcmask 261120  }
  0x36   : > { %199 = vrot.lane.b32.xlu0 %v373_v0, %s538_s4  ;;  %207 = vrot.lane.b32.xlu1 %v192_v1, %s538_s4  ;;  %v374_v2 = vld [vmem:[%s167_s11 + $0x18] sm:$0xff]  ;;  %v193_v3 = vld [vmem:[%s167_s11 + $0x10] sm:$0xff]  ;;  %vm222_vm1 = vcmask 523264   ;;  %vm225_vm2 = vcmask 785408   ;;  %s372_s8 = sshll.u32 %s659_s5, 4  ;;  %s384_s20 = sshll.u32 %s584_s16, 8 }
  0x37   : > { %v375_v36 = vld [vmem:[%s723_s1] ss:$0 sm:$0xff]  ;;  %s189_s22 = scalar_lea.vmem [#allocation5], %s372_s8  ;;  %s678_s29 = scalar_lea.hbm %s725_s3, %s384_s20 }
  0x38   : > { %v376_v38 = vld [vmem:[%s724_s2] ss:$0 sm:$0xff]  ;;  %s290_s26 = sshll.u32 %s189_s22, 4  ;;  %s277_s30 = scalar_lea.sflag [#allocation4], %s659_s5  ;;  %s680_s26 = int_to_ptr.vmem [resolvable:$true] %s290_s26 }
  0x39   : > { %s469_s9 = scalar_lea.vmem %s680_s26, 256  ;;  %p734_p11 = scmp.ne.s32.totalorder %s730_s24, 0 }
  0x3a   : > { %201 = vrot.lane.b32.xlu0 %v374_v2, %s538_s4  ;;  %209 = vrot.lane.b32.xlu1 %v193_v3, %s538_s4  ;;  %p470_p10 = scmp.ne.s32.totalorder %s680_s26, %s469_s9  ;;  %s540_s16 = smov [#allocation5]  }
  0x3b   : > { %s473_s10 = sshll.u32 %s540_s16, 4  ;;  %s474_s10 = int_to_ptr.vmem [resolvable:$false] %s473_s10 }
  0x3c   : > { %p471_p12 = pnand %p470_p10, %p734_p11  ;;  %s475_s11 = scalar_lea.vmem %s474_s10, 512 }
  0x3d   : > { %p476_p5 = scmp.lt.s32.totalorder %s680_s26, %s474_s10  ;;  %p477_p7 = scmp.lt.s32.totalorder %s475_s11, %s469_s9 }
  0x3e   : > { %213 = vrot.lane.b32.xlu0 %v373_v0, %s539_s6  ;;  %215 = vrot.lane.b32.xlu1 %v374_v2, %s539_s6  ;;  %p472_p4 = pneg %p471_p12 }
  0x3f   : > { %p478_p8 = por %p477_p7, %p476_p5 }
  0x41   : > { %p479_p9 = pnand %p478_p8, %p472_p4 }
  0xa8   : > { %v200_v4 = vpop.permute.xlu0 %199  ;;  %v208_v5 = vpop.permute.xlu1 %207 }
  0xa9   : > { %v220_v8 = vsel %vm219_vm0, %v192_v1, %v200_v4 }
  0xaa   : > { %v223_v10 = vsel %vm222_vm1, %v220_v8, %v208_v5 }
  0xac   : > { %v202_v6 = vpop.permute.xlu0 %201  ;;  %v210_v7 = vpop.permute.xlu1 %209 }
  0xad   : > { %v221_v9 = vsel %vm219_vm0, %v193_v3, %v202_v6 }
  0xae   : > { %v224_v11 = vsel %vm222_vm1, %v221_v9, %v210_v7 }
  0xb0   : > { %v214_v12 = vpop.permute.xlu0 %213  ;;  %v216_v13 = vpop.permute.xlu1 %215 }
  0xb1   : > { %v227_v14 = vsel %vm225_vm2, %v224_v11, %v216_v13  ;;  %v226_v15 = vsel %vm225_vm2, %v223_v10, %v214_v12 }
  0xb2   : > { %230 = vadd.xlane.f32.xlu1 %v227_v14  ;;  %228 = vadd.xlane.f32.xlu0 %v226_v15  ;;  %v232_v16 = vmul.f32 %v226_v15, %v226_v15  ;;  %v233_v17 = vmul.f32 %v227_v14, %v227_v14 }
  0xb6   : > { %234 = vadd.xlane.f32.xlu0 %v232_v16 }
  0xba   : > { %236 = vadd.xlane.f32.xlu0 %v233_v17 }
 0x13b   : > { %v229_v18 = vpop.xlane.xlu0 %228  ;;  %v231_v20 = vpop.xlane.xlu1 %230 }
 0x13c   : > { %v238_v19 = vmul.f32 0.0078125, %v229_v18  ;;  %v239_v22 = vmul.f32 0.0078125, %v231_v20 }
 0x13e   : > { %v242_v23 = vmul.f32 %v238_v19, %v238_v19  ;;  %v243_v27 = vmul.f32 %v239_v22, %v239_v22  ;;  %v252_v34 = vsub.f32 %v226_v15, %v238_v19  ;;  %v253_v39 = vsub.f32 %v227_v14, %v239_v22 }
 0x13f   : > { %v235_v21 = vpop.xlane.xlu0 %234 }
 0x140   : > { %v240_v24 = vmul.f32 0.0078125, %v235_v21 }
 0x142   : > { %v244_v25 = vsub.f32 %v240_v24, %v242_v23 }
 0x143   : > { %v237_v26 = vpop.xlane.xlu0 %236 }
 0x144   : > { %v246_v28 = vmax.f32 %v244_v25, 0.0  ;;  %v241_v29 = vmul.f32 0.0078125, %v237_v26 }
 0x146   : > { %v248_v30 = vadd.f32 1e-05, %v246_v28  ;;  %v245_v31 = vsub.f32 %v241_v29, %v243_v27 }
 0x148   : > { %437 = vrsqrt.f32 %v248_v30  ;;  %v247_v32 = vmax.f32 %v245_v31, 0.0 }
 0x14a   : > { %v249_v33 = vadd.f32 1e-05, %v247_v32 }
 0x14c   : > { %439 = vrsqrt.f32 %v249_v33 }
 0x155   : > { %v438_v35 = vpop.eup %437 }
 0x156   : > { %v254_v37 = vmul.f32 %v438_v35, %v252_v34 }
 0x158   : > { %v263_v40 = vmul.f32 %v375_v36, %v254_v37 }
 0x159   : > { %v440_v41 = vpop.eup %439 }
 0x15a   : > { %v255_v42 = vmul.f32 %v440_v41, %v253_v39  ;;  %v272_v43 = vadd.f32 %v376_v38, %v263_v40 }
 0x15c   : > { %v264_v44 = vmul.f32 %v375_v36, %v255_v42  ;;  %274 = vst [vmem:[%s189_s22] sm:$0xff] %v272_v43 }
 0x15e   : > { %v273_v45 = vadd.f32 %v376_v38, %v264_v44 }
 0x160   : > { %275 = vst [vmem:[%s189_s22 + $0x8] sm:$0xff] %v273_v45 }
 0x161   : > { %482 = shalt.err (!%p479_p9)
}
 0x162   : > { %s483_s4 = scalar_lea.hbm %s678_s29, 256  ;;  %s487_s7 = scalar_lea.hbm %s725_s3, 2048 }
 0x163   : > { %p484_p13 = scmp.ne.s32.totalorder %s678_s29, %s483_s4  ;;  %p488_p2 = scmp.lt.s32.totalorder %s678_s29, %s725_s3 }
 0x164   : > { %p489_p3 = scmp.lt.s32.totalorder %s487_s7, %s483_s4 }
 0x165   : > { %p485_p1 = pnand %p484_p13, %p734_p11 }
 0x166   : > { %p490_p6 = por %p489_p3, %p488_p2 }
 0x167   : > { %p486_p0 = pneg %p485_p1 }
 0x169   : > { %p491_p10 = pnand %p490_p6, %p486_p0 }
 0x16b   : > { %494 = shalt.err (!%p491_p10)
}
 0x16c   : > { %s541_s19 = smov 128   ;;  %s542_s20 = smov 8  }
 0x16d   : > { %387 = dma.vmem_to_hbm [thread:$0]  (%p734_p11), %s680_s26, 256, %s678_s29, %s277_s30, %s541_s19, %s541_s19, %s542_s20  }
 0x16e PF: > { %p398_p12 = scmp.ge.s32.totalorder %s533_s15, 2  ;;  %s305_s22 = sand.u32 1, %s521_s12  }
 0x16f   : > { %p735_p4 = scmp.ne.s32.totalorder %s731_s25, 0  ;;  %s306_s27 = scalar_lea.sflag [#allocation4], %s305_s22 }
 0x171   : > { %p394_p5 = pnand %p398_p12, %p735_p4 }
 0x173   : > { %p395_p7 = pneg %p394_p5 }
 0x175   : > { %516 = dma.done.wait (%p395_p7), %s306_s27, 256  }
 0x176   : > { %518 = vsyncadd (%p395_p7), %s306_s27, 4294967040  ;;  %p16_p8 = scmp.ge.s32.totalorder %s588_s18, 10   ;;  %s736_s12 = smov %s525_s13 }
 0x177   : > { %s737_s13 = smov %s529_s14  ;;  %s738_s14 = smov %s600_s21 }
 0x178   : > { %s739_s15 = smov %s588_s18  ;;  %18 = sbr.rel (!%p16_p8) target bundleno = 5 (0x5), region = 78 }
 0x17d   :  { %311 = vsyncpa [#allocation3], 1 }
 0x17e   :  { %313 = vsyncpa [#allocation3 + $0x1], 1 }
 0x17f   :  { %314 = vsyncpa [#allocation4], 1 }
 0x180   :  { %316 = vsyncpa [#allocation4 + $0x1], 1 }

</bundles_post_ra>
